<compile_context>
chip_gen: v7x
topology: tpu7x:2x2x1
jax: 0.10.0
libtpu: 0.0.40
codegen_flags: <defaults>
</compile_context>

<pallas_src>
import functools

import jax
import jax.numpy as jnp
from jax.experimental import pallas as pl
from jax.experimental.pallas import tpu as pltpu

LANE = 128


def _cdiv(a, b):
    return (a + b - 1) // b


def _round_up(a, b):
    return _cdiv(a, b) * b


def _gap_kernel(x_ref, o_ref, acc_ref, *, hw, inv_hw, mask_tail):
    """x_ref: (1, tc, thw) block (C on sublanes, HW on lanes).
    o_ref: (1, 1, tc, 1) output block. acc_ref: (tc, 1) f32 scratch."""
    k = pl.program_id(2)  # HW (reduction) axis -- last grid axis

    @pl.when(k == 0)
    def _():
        acc_ref[...] = jnp.zeros_like(acc_ref)

    x = x_ref[0]  # (tc, thw)
    if mask_tail:
        # Zero lanes beyond the true H*W on the (partial) last tile.  Cheap
        # VPU work, free under the HBM roofline; mandatory now that there is
        # no wrapper-side zero padding.
        pos = k * x.shape[-1] + jax.lax.broadcasted_iota(jnp.int32, x.shape, 1)
        x = jnp.where(pos < hw, x, jnp.zeros_like(x))

    # Lane-axis reduction with f32 accumulation (mostly VPU adds + one XLU
    # fold per row group -- both units idle in this HBM-bound kernel).
    acc_ref[...] += jnp.sum(x, axis=-1, keepdims=True, dtype=jnp.float32)

    @pl.when(k == pl.num_programs(2) - 1)
    def _():
        # Divide by the TRUE H*W (not the padded tile extent).
        o_ref[0, 0] = (acc_ref[...] * inv_hw).astype(o_ref.dtype)


def global_average_pooling(x, *, block_bytes=8 * 1024 * 1024):
    """x: (B, C, H, W) -> ((B, C) spatial mean, lat, mem)."""
    B, C, H, W = x.shape
    HW = H * W
    itemsize = jnp.dtype(x.dtype).itemsize
    sub = 8 * (4 // itemsize)  # sublane packing: f32 -> 8, bf16 -> 16, int8 -> 32

    # (B, C, H, W) -> (B, C, HW) is a free reshape: no HBM traffic, no transpose.
    x3 = x.reshape(B, C, HW)

    # --- channel tile (sublane axis). Aim for >= 2 channel blocks so both
    # v7x TensorCores get work; the last block may be partial (no padding).
    if C < 2 * sub:
        tc = C  # full-dim block is always layout-legal
    else:
        tc = min(_round_up(_cdiv(C, 2), sub), 512)
    n_c = _cdiv(C, tc)

    # --- HW tile (lane axis): multiple of 128, or the full dim when HW <= 128.
    if HW <= LANE:
        thw = HW
    else:
        budget = max(LANE, (block_bytes // (tc * itemsize)) // LANE * LANE)
        thw = min(budget, (HW // LANE) * LANE)

        # Keep >= ~8 total grid steps for DMA/compute overlap as long as the
        # block stays >= ~1 MiB (already at the ~85% HBM-roofline plateau).
        def _half(t):
            return max(LANE, ((t // 2) // LANE) * LANE)

        while (B * n_c * _cdiv(HW, thw) < 8 and thw > LANE
               and tc * _half(thw) * itemsize >= (1 << 20)):
            thw = _half(thw)
    n_hw = _cdiv(HW, thw)
    mask_tail = (n_hw * thw) != HW
    inv_hw = 1.0 / float(HW)

    kernel = functools.partial(_gap_kernel, hw=HW, inv_hw=inv_hw, mask_tail=mask_tail)

    # Output is (B, n_c, tc, 1): the last two block dims equal the full array
    # dims, so any tc is layout-legal; the tiny reshape/slice below is host-side
    # glue over B * n_c * tc elements only.
    out = pl.pallas_call(
        kernel,
        out_shape=jax.ShapeDtypeStruct((B, n_c, tc, 1), x.dtype),
        grid_spec=pltpu.PrefetchScalarGridSpec(
            num_scalar_prefetch=0,
            grid=(B, n_c, n_hw),
            in_specs=[pl.BlockSpec((1, tc, thw), lambda b, c, k: (b, c, k))],
            out_specs=pl.BlockSpec((1, 1, tc, 1), lambda b, c, k: (b, c, 0, 0)),
            scratch_shapes=[pltpu.VMEM((tc, 1), jnp.float32)],
        ),
        compiler_params=pltpu.CompilerParams(
            dimension_semantics=("parallel", "parallel", "arbitrary"),
            vmem_limit_bytes=32 * 1024 * 1024,
        ),
        cost_estimate=pl.CostEstimate(
            flops=B * C * HW,
            transcendentals=0,
            bytes_accessed=B * C * HW * itemsize + B * C * itemsize,
        ),
    )(x3)

    res = out.reshape(B, n_c * tc)[:, :C]

    # TODO(synk): lookup_torch('global_average_pooling2d', ...) latency/memory
    # table lookup has no Pallas equivalent; return placeholder scalars.
    lat = jnp.float32(0.0)
    mem = jnp.float32(0.0)
    return res, lat, mem


if __name__ == "__main__":
    key = jax.random.PRNGKey(0)

    # Primary small shape consistent with the module.
    B, C, H, W = 2, 4, 16, 16
    x = jax.random.normal(key, (B, C, H, W), dtype=jnp.float32)
    res, lat, mem = global_average_pooling(x)
    jax.block_until_ready(res)
    ref = jnp.mean(x.reshape(B, C, -1), axis=2)
    assert res.shape == (B, C)
    assert jnp.allclose(res, ref, atol=1e-5, rtol=1e-5)

    # Misaligned shape: exercises partial channel blocks + in-kernel HW masking.
    B2, C2, H2, W2 = 2, 20, 13, 11
    x2 = jax.random.normal(jax.random.PRNGKey(0), (B2, C2, H2, W2), dtype=jnp.float32)
    res2, _, _ = global_average_pooling(x2)
    jax.block_until_ready(res2)
    ref2 = jnp.mean(x2.reshape(B2, C2, -1), axis=2)
    assert res2.shape == (B2, C2)
    assert jnp.allclose(res2, ref2, atol=1e-5, rtol=1e-5)

    print("KERNEL_OK")
</pallas_src>

<mosaic_0001>
module attributes {stable_mosaic.version = 11 : i64} {
  func.func @_gap_kernel(%arg0: i32, %arg1: i32, %arg2: i32, %arg3: memref<1x4x256xf32, #tpu.memory_space<vmem>>, %arg4: memref<1x1x4x1xf32, #tpu.memory_space<vmem>>, %arg5: memref<4x1xf32, #tpu.memory_space<vmem>>) attributes {dimension_semantics = [#tpu.dimension_semantics<parallel>, #tpu.dimension_semantics<parallel>, #tpu.dimension_semantics<arbitrary>], iteration_bounds = array<i64: 2, 1, 1>, scalar_prefetch = 0 : i64, scratch_operands = 1 : i64, tpu.core_type = #tpu.core_type<tc>, window_params = [{transform_indices = @transform_0, window_bounds = array<i64: 1, 4, 256>}, {transform_indices = @transform_1, window_bounds = array<i64: 1, 1, 4, 1>}]} {
    %c0_i32 = arith.constant 0 : i32
    %0 = arith.cmpi eq, %arg2, %c0_i32 : i32
    %1 = arith.extui %0 : i1 to i32
    %c0_i32_0 = arith.constant 0 : i32
    %2 = arith.cmpi ne, %1, %c0_i32_0 : i32
    scf.if %2 {
      %cst_9 = arith.constant 0.000000e+00 : f32
      %13 = vector.broadcast %cst_9 : f32 to vector<4x1xf32>
      %c0_10 = arith.constant 0 : index
      %c0_11 = arith.constant 0 : index
      %14 = vector.load %arg5[%c0_10, %c0_11] : memref<4x1xf32, #tpu.memory_space<vmem>>, vector<4x1xf32>
      tpu.vector_store %arg5[%c0_10, %c0_11], %13 {strides = array<i32>} : memref<4x1xf32, #tpu.memory_space<vmem>>, vector<4x1xf32>,
    } else {
    }
    %c0 = arith.constant 0 : index
    %c0_1 = arith.constant 0 : index
    %c0_2 = arith.constant 0 : index
    %3 = vector.load %arg3[%c0, %c0_1, %c0_2] : memref<1x4x256xf32, #tpu.memory_space<vmem>>, vector<1x4x256xf32>
    %4 = vector.shape_cast %3 : vector<1x4x256xf32> to vector<4x256xf32>
    %c0_3 = arith.constant 0 : index
    %c0_4 = arith.constant 0 : index
    %5 = vector.load %arg5[%c0_3, %c0_4] : memref<4x1xf32, #tpu.memory_space<vmem>>, vector<4x1xf32>
    %cst = arith.constant dense<0.000000e+00> : vector<4xf32>
    %6 = vector.multi_reduction <add>, %4, %cst [1] : vector<4x256xf32> to vector<4xf32>
    %7 = vector.shape_cast %6 : vector<4xf32> to vector<4x1xf32>
    %8 = arith.addf %5, %7 : vector<4x1xf32>
    %c0_5 = arith.constant 0 : index
    %c0_6 = arith.constant 0 : index
    %9 = vector.load %arg5[%c0_5, %c0_6] : memref<4x1xf32, #tpu.memory_space<vmem>>, vector<4x1xf32>
    tpu.vector_store %arg5[%c0_5, %c0_6], %8 {strides = array<i32>} : memref<4x1xf32, #tpu.memory_space<vmem>>, vector<4x1xf32>,
    %c0_i32_7 = arith.constant 0 : i32
    %10 = arith.cmpi eq, %arg2, %c0_i32_7 : i32
    %11 = arith.extui %10 : i1 to i32
    %c0_i32_8 = arith.constant 0 : i32
    %12 = arith.cmpi ne, %11, %c0_i32_8 : i32
    scf.if %12 {
      %c0_9 = arith.constant 0 : index
      %c0_10 = arith.constant 0 : index
      %13 = vector.load %arg5[%c0_9, %c0_10] : memref<4x1xf32, #tpu.memory_space<vmem>>, vector<4x1xf32>
      %cst_11 = arith.constant 3.906250e-03 : f32
      %14 = vector.broadcast %cst_11 : f32 to vector<4x1xf32>
      %15 = arith.mulf %13, %14 : vector<4x1xf32>
      %c0_12 = arith.constant 0 : index
      %c0_13 = arith.constant 0 : index
      %c0_14 = arith.constant 0 : index
      %c0_15 = arith.constant 0 : index
      %16 = vector.load %arg4[%c0_12, %c0_13, %c0_14, %c0_15] : memref<1x1x4x1xf32, #tpu.memory_space<vmem>>, vector<1x1x4x1xf32>
      %17 = vector.shape_cast %16 : vector<1x1x4x1xf32> to vector<4x1xf32>
      %18 = vector.shape_cast %15 : vector<4x1xf32> to vector<1x1x4x1xf32>
      tpu.vector_store %arg4[%c0_12, %c0_13, %c0_14, %c0_15], %18 {strides = array<i32>} : memref<1x1x4x1xf32, #tpu.memory_space<vmem>>, vector<1x1x4x1xf32>,
    } else {
    }
    return
  }
  func.func @transform_0(%arg0: i32, %arg1: i32, %arg2: i32) -> (i32, i32, i32) {
    %c0_i32 = arith.constant 0 : i32
    return %arg0, %arg1, %arg2 : i32, i32, i32
  }
  func.func @transform_1(%arg0: i32, %arg1: i32, %arg2: i32) -> (i32, i32, i32, i32) {
    %c0_i32 = arith.constant 0 : i32
    %c0_i32_0 = arith.constant 0 : i32
    %c0_i32_1 = arith.constant 0 : i32
    return %arg0, %arg1, %c0_i32, %c0_i32_0 : i32, i32, i32, i32
  }
}

</mosaic_0001>

<bundles_post_ra>
// kernel: tpu_custom_call.1
= control target key start
LH: loop header
LB: loop body
LE: loop exit
PB: predicated region body
PF: predicated region fallthrough
CT: control target
= control target key end

     0   :  { %6 = vsyncpa [#allocation4], 0  ;;  %s578_s0 = inlined_call_operand.hbm [shape: f32[2,4,256], index: 0, kind: input, shape index: {}]   ;;  %s579_s1 = inlined_call_operand.vmem [shape: f32[2,1,4,1], index: 1, kind: output, shape index: {}]  }
   0x1   :  { %8 = vsyncpa [#allocation4 + $0x1], 0  ;;  %s450_s6 = smov 0   ;;  %s452_s7 = smov 0  }
   0x2   :  { %s454_s8 = smov 0   ;;  %s456_s9 = smov 0  }
   0x3   :  { %s458_s10 = smov 0   ;;  %s460_s11 = smov 0  }
   0x4 LB: > { %s286_s12 = sadd.s32 4294967295, %s436_s11   ;;  %s33_s13 = sadd.s32 1, %s432_s10  ;;  %s436_s11 = sphi %s460_s11, %s14_s11   ;;  %s432_s10 = sphi %s458_s10, %s589_s10   ;;  %s428_s9 = sphi %s456_s9, %s588_s9   ;;  %s424_s8 = sphi %s454_s8, %s587_s8   ;;  %s420_s7 = sphi %s452_s7, %s586_s7   ;;  %s416_s6 = sphi %s450_s6, %s585_s6  }
   0x5   : > { %p35_p0 = scmp.ge.s32.totalorder %s33_s13, 2  ;;  %s44_s14 = sadd.s32 1, %s424_s8 }
   0x6   : > { %p51_p1 = scmp.ne.s32.totalorder %s424_s8, %s420_s7  ;;  %p52_p2 = scmp.eq.s32.totalorder %s436_s11, 0 }
   0x7   : > { %s591_s13 = smov (%p35_p0, %s33_s13), 0  ;;  %p57_p4 = scmp.ne.s32.totalorder %s420_s7, %s416_s6 }
   0x8   : > { %p486_p3 = por %p52_p2, %p51_p1  ;;  %s37_s16 = ssub.s32 %s432_s10, %s591_s13 }
   0x9   : > { %p58_p5 = scmp.eq.s32.totalorder %s286_s12, 0  ;;  %p42_p6 = scmp.eq.s32.totalorder %s37_s16, 0 }
   0xa   : > { %p305_p8 = scmp.lt.s32.totalorder %s436_s11, 2  ;;  %s109_s19 = sand.u32 1, %s424_s8  }
   0xb   : > { %p493_p7 = por %p58_p5, %p57_p4  ;;  %s298_s20 = sshll.u32 %s432_s10, 7 }
   0xc   : > { %s499_s18 = scalar_select %p42_p6, %s424_s8, %s44_s14  }
   0xd   : > { %s290_s21 = sshll.u32 %s109_s19, 3  ;;  %s506_s24 = scalar_lea.hbm %s578_s0, %s298_s20 }
   0xe   : > { %s113_s25 = scalar_lea.vmem [#allocation3], %s290_s21  ;;  %p510_p9 = pnand %p305_p8, %p486_p3 }
   0xf   : > { %s125_s26 = sshll.u32 %s113_s25, 4  ;;  %s110_s28 = scalar_lea.sflag [#allocation4], %s109_s19  ;;  %s514_s26 = int_to_ptr.vmem [resolvable:$true] %s125_s26 }
  0x10   : > { %s356_s29 = scalar_lea.hbm %s506_s24, 128  ;;  %p358_p13 = pneg %p510_p9 }
  0x11   : > { %p357_p12 = scmp.ne.s32.totalorder %s506_s24, %s356_s29  ;;  %s361_s3 = scalar_lea.hbm %s578_s0, 256 }
  0x12   : > { %p362_p2 = scmp.lt.u32.totalorder %s506_s24, %s578_s0  ;;  %p363_p3 = scmp.lt.u32.totalorder %s361_s3, %s356_s29 }
  0x13   : > { %p359_p0 = pnand %p358_p13, %p357_p12  ;;  %p365_p5 = scmp.lt.u32.totalorder %s356_s29, %s506_s24 }
  0x14   : > { %p364_p4 = por %p363_p3, %p362_p2 }
  0x15   : > { %p360_p1 = pneg %p359_p0 }
  0x16   : > { %p366_p6 = por %p365_p5, %p364_p4 }
  0x18   : > { %p367_p8 = pnand %p366_p6, %p360_p1 }
  0x1a   : > { %370 = shalt.err (!%p367_p8)
}
  0x1b   : > { %s371_s6 = scalar_lea.vmem %s514_s26, 128  ;;  %s438_s12 = smov [#allocation3]  }
  0x1c   : > { %p372_p12 = scmp.ne.s32.totalorder %s514_s26, %s371_s6  ;;  %s376_s14 = sshll.u32 %s438_s12, 4  ;;  %s377_s14 = int_to_ptr.vmem [resolvable:$false] %s376_s14 }
  0x1d   : > { %s378_s15 = scalar_lea.vmem %s377_s14, 256  ;;  %p379_p11 = scmp.lt.s32.totalorder %s514_s26, %s377_s14 }
  0x1e   : > { %p374_p0 = pnand %p372_p12, %p358_p13  ;;  %p380_p2 = scmp.lt.s32.totalorder %s378_s15, %s371_s6 }
  0x20   : > { %p375_p10 = pneg %p374_p0  ;;  %p381_p3 = por %p380_p2, %p379_p11 }
  0x22   : > { %p382_p4 = pnand %p381_p3, %p375_p10 }
  0x24   : > { %385 = shalt.err (!%p382_p4)
}
  0x25   : > { %304 = dma.hbm_to_vmem [thread:$0]  (!%p510_p9), %s506_s24, 128, %s514_s26, %s110_s28  }
  0x26   : > { %p583_p1 = scmp.lt.s32.totalorder %s436_s11, 3  ;;  %p584_p5 = scmp.ge.s32.totalorder %s436_s11, 1 }
  0x28   : > { %p131_p13 = pnand %p584_p5, %p583_p1 }
  0x29   : > { %s136_s16 = sand.u32 (!%p131_p13), 1, %s420_s7  }
  0x2a   : > { %134 = sbr.rel (%p131_p13) target bundleno = 211 (0xd3), region = 24  ;;  %s294_s19 = sshll.u32 (!%p131_p13), %s136_s16, 3 }
  0x2b   : > { %s137_s20 = scalar_lea.sflag (!%p131_p13), [#allocation4], %s136_s16  ;;  %s140_s21 = scalar_lea.vmem (!%p131_p13), [#allocation3], %s294_s19 }
  0x31   : > { %411 = dma.done.wait (%p493_p7), %s137_s20, 128  }
  0x32   : > { %413 = vsyncadd (%p493_p7), %s137_s20, 4294967168  ;;  %vm173_vm0 = vcmask 3072   ;;  %v439_v0 = vmov 0.0   ;;  %vm180_vm1 = vcmask 1043456   ;;  %v175_v1 = vld [vmem:[%s140_s21] sm:$0xff]  ;;  %p162_p9 = scmp.lt.s32.totalorder %s428_s9, 1 }
  0x33   : > { %174 = vst.msk [vmem:[#allocation2] sm:$0xf] %vm173_vm0, %v439_v0  ;;  %v178_v2 = vcombine.high %v175_v1, %v175_v1  ;;  %v181_v3 = vsel %vm180_vm1, %v175_v1, 0.0 }
  0x34   : > { %s593_s9 = smov (!%p162_p9, %s428_s9), 1 }
  0x35   : > { %v182_v4 = vsel %vm180_vm1, %v178_v2, 0.0  ;;  %s295_s17 = sshll.u32 %s593_s9, 2 }
  0x36   : > { %v183_v5 = vadd.f32 %v182_v4, %v181_v3  ;;  %s168_s24 = scalar_lea.vmem %s579_s1, %s295_s17 }
  0x38   : > { %184 = vadd.xlane.f32.xlu0 %v183_v5 }
  0x3a   : > { %v176_v6 = vld [vmem:[#allocation2] sm:$0xf] }
  0xc5   : > { %v185_v7 = vpop.xlane.xlu0 %184 }
  0xc6   : > { %v186_v8 = vadd.f32 %v185_v7, %v176_v6 }
  0xc8   : > { %188 = vst.msk [vmem:[#allocation2] sm:$0xf] %vm173_vm0, %v186_v8 }
  0xcf   : > { %v192_v9 = vld [vmem:[#allocation2] sm:$0xf] }
  0xd0   : > { %v193_v10 = vmul.f32 0.00390625, %v192_v9 }
  0xd2   : > { %194 = vst.msk [vmem:[%s168_s24] sm:$0xf] %vm173_vm0, %v193_v10 }
  0xd3 PF: > { %s14_s11 = sadd.s32 1, %s436_s11   ;;  %s585_s6 = smov %s420_s7 }
  0xd4   : > { %p11_p7 = scmp.ge.s32.totalorder %s14_s11, 4   ;;  %s586_s7 = smov %s424_s8 }
  0xd5   : > { %s587_s8 = smov %s499_s18  ;;  %s588_s9 = smov %s432_s10 }
  0xd6   : > { %s589_s10 = smov %s591_s13  ;;  %13 = sbr.rel (!%p11_p7) target bundleno = 4 (0x4), region = 72 }
  0xdd   :  { %220 = vsyncpa [#allocation4], 1 }
  0xde   :  { %222 = vsyncpa [#allocation4 + $0x1], 1 }

</bundles_post_ra>
